<compile_context>
chip_gen: v6e
topology: v6e:2x2x1
jax: 0.10.0
libtpu: 0.0.40
codegen_flags: <defaults>
</compile_context>

<pallas_src>
import functools

import jax
import jax.numpy as jnp
from jax.experimental import pallas as pl
from jax.experimental.pallas import tpu as pltpu


def _attn_kernel(hb_ref, enc_ref, we_ref, v_ref, out_ref, *,
                 seq_len, batches_per_step):
    # hb_ref : (hidden, Nc)     precomputed Wh @ hidden + bias, broadcast over L
    # enc_ref: (enc_dim, Nc)    lane-concatenated encoder features (b-major)
    # we_ref : (hidden, enc_dim)
    # v_ref  : (1, hidden)
    # out_ref: (1, Nc)          Nc = batches_per_step * seq_len
    energy = jnp.tanh(
        jnp.dot(we_ref[...], enc_ref[...], preferred_element_type=jnp.float32)
        + hb_ref[...])                                              # (hidden, Nc)

    scores = jnp.dot(v_ref[...], energy,
                     preferred_element_type=jnp.float32)            # (1, Nc)

    # Per-batch softmax: each batch owns a contiguous segment of seq_len lanes.
    parts = []
    for b in range(batches_per_step):
        s = scores[:, b * seq_len:(b + 1) * seq_len]                # (1, L)
        m = jnp.max(s, axis=-1, keepdims=True)
        e = jnp.exp(s - m)
        denom = jnp.sum(e, axis=-1, keepdims=True)
        # approx=False keeps full f32 accuracy (1e-5 tolerance); approx=True
        # would move the divide to the EUP at ~bf16 accuracy.
        parts.append(e * pl.reciprocal(denom, approx=False))
    out_ref[...] = jnp.concatenate(parts, axis=-1)                  # (1, Nc)


def attn_forward(hidden, encoder_outputs, W, bias, v, *, num_chunks=1):
    """hidden: (B, hidden_size); encoder_outputs: (L=H*W, B, 256+onehot).
    Returns (B, 1, L) attention weights (softmax over L), matching Attn.forward.

    num_chunks splits the batch across grid steps (keep (B//num_chunks)*L a
    multiple of 128); num_chunks=1 gives a single lane-dense grid step.
    """
    L, B, enc_dim = encoder_outputs.shape
    hidden_size = hidden.shape[1]
    assert B % num_chunks == 0
    bpc = B // num_chunks              # batches per grid step
    Nc = bpc * L                       # lane width per grid step

    hidden = hidden.astype(jnp.float32)
    encoder_outputs = encoder_outputs.astype(jnp.float32)
    W = W.astype(jnp.float32)
    bias = bias.astype(jnp.float32)
    v = v.astype(jnp.float32)

    # Split Linear weight to match torch.cat([H, encoder_outputs], 2) ordering.
    Wh = W[:, :hidden_size]            # (hidden, hidden)
    We = W[:, hidden_size:]            # (hidden, enc_dim)

    # Hoisted hidden-state term: one tiny XLA matmul over the whole batch,
    # broadcast over the L spatial positions (b-major column order).
    hb = (hidden @ Wh.T + bias).T      # (hidden, B)
    hb_bcast = jnp.repeat(hb, L, axis=1)                   # (hidden, B*L)

    # Lane-concatenate all batches: column index = b*L + l.
    # TODO(synk): ideally the producer would emit encoder features already in
    # (B, enc_dim, L)/(enc_dim, B*L) layout to avoid this wrapper transpose.
    enc_all = jnp.transpose(encoder_outputs, (2, 1, 0)).reshape(enc_dim, B * L)

    v2 = v[None, :]                    # (1, hidden)

    kernel = functools.partial(_attn_kernel, seq_len=L, batches_per_step=bpc)

    out = pl.pallas_call(
        kernel,
        out_shape=jax.ShapeDtypeStruct((1, B * L), jnp.float32),
        grid=(num_chunks,),
        in_specs=[
            pl.BlockSpec((hidden_size, Nc), lambda i: (0, i)),       # hb_bcast
            pl.BlockSpec((enc_dim, Nc), lambda i: (0, i)),           # enc_all
            pl.BlockSpec((hidden_size, enc_dim), lambda i: (0, 0)),  # We
            pl.BlockSpec((1, hidden_size), lambda i: (0, 0)),        # v
        ],
        out_specs=pl.BlockSpec((1, Nc), lambda i: (0, i)),
        compiler_params=pltpu.CompilerParams(
            dimension_semantics=("parallel",)),
    )(hb_bcast, enc_all, We, v2)

    return out.reshape(B, 1, L)


def attn_reference(hidden, encoder_outputs, W, bias, v):
    """Pure-JAX transcription of the PyTorch forward."""
    L, B, _ = encoder_outputs.shape
    Hrep = jnp.broadcast_to(hidden[:, None, :], (B, L, hidden.shape[1]))
    encT = jnp.transpose(encoder_outputs, (1, 0, 2))       # (B, L, enc_dim)
    x = jnp.concatenate([Hrep, encT], axis=2)              # (B, L, in_dim)
    energy = jnp.tanh(x @ W.T + bias)                      # (B, L, hidden)
    scores = energy @ v                                    # (B, L)
    return jax.nn.softmax(scores, axis=1)[:, None, :]      # (B, 1, L)


if __name__ == "__main__":
    # Small, module-consistent shapes.
    B = 2
    hidden_size = 32
    onehot_size = 16
    enc_dim = 256 + onehot_size        # encoder feature dim implied by Linear
    Hs, Ws = 8, 8
    L = Hs * Ws                        # B*L = 128 -> one lane-dense grid step

    key = jax.random.PRNGKey(0)
    k_hid, k_enc, k_w, k_b, k_v = jax.random.split(key, 5)

    # Inputs
    hidden = jax.random.normal(k_hid, (B, hidden_size), dtype=jnp.float32)
    encoder_outputs = jax.random.normal(k_enc, (L, B, enc_dim), dtype=jnp.float32)

    # Deterministic synthetic parameters (shapes from __init__)
    in_features = 256 + hidden_size + onehot_size
    lim = 1.0 / jnp.sqrt(jnp.float32(in_features))
    W = jax.random.uniform(k_w, (hidden_size, in_features),
                           minval=-lim, maxval=lim, dtype=jnp.float32)
    bias = jax.random.uniform(k_b, (hidden_size,),
                              minval=-lim, maxval=lim, dtype=jnp.float32)
    stdv = 1.0 / (hidden_size ** 0.5)
    v = stdv * jax.random.normal(k_v, (hidden_size,), dtype=jnp.float32)

    out = attn_forward(hidden, encoder_outputs, W, bias, v)
    out = jax.block_until_ready(out)

    ref = attn_reference(hidden, encoder_outputs, W, bias, v)
    assert out.shape == (B, 1, L), out.shape
    assert jnp.allclose(out, ref, rtol=1e-5, atol=1e-5), \
        f"max abs err {jnp.max(jnp.abs(out - ref))}"

    print("KERNEL_OK")
</pallas_src>

<mosaic_0001>
module attributes {stable_mosaic.version = 11 : i64} {
  func.func @_attn_kernel(%arg0: i32, %arg1: memref<32x128xf32, #tpu.memory_space<vmem>>, %arg2: memref<272x128xf32, #tpu.memory_space<vmem>>, %arg3: memref<32x272xf32, #tpu.memory_space<vmem>>, %arg4: memref<1x32xf32, #tpu.memory_space<vmem>>, %arg5: memref<1x128xf32, #tpu.memory_space<vmem>>) attributes {dimension_semantics = [#tpu.dimension_semantics<parallel>], iteration_bounds = array<i64: 1>, scalar_prefetch = 0 : i64, scratch_operands = 0 : i64, tpu.core_type = #tpu.core_type<tc>, window_params = [{transform_indices = @transform_0, window_bounds = array<i64: 32, 128>}, {transform_indices = @transform_1, window_bounds = array<i64: 272, 128>}, {pipeline_mode = #tpu.pipeline_mode<synchronous>, transform_indices = @transform_2, window_bounds = array<i64: 32, 272>}, {pipeline_mode = #tpu.pipeline_mode<synchronous>, transform_indices = @transform_3, window_bounds = array<i64: 1, 32>}, {transform_indices = @transform_4, window_bounds = array<i64: 1, 128>}]} {
    %c0 = arith.constant 0 : index
    %c0_0 = arith.constant 0 : index
    %0 = vector.load %arg3[%c0, %c0_0] : memref<32x272xf32, #tpu.memory_space<vmem>>, vector<32x272xf32>
    %c0_1 = arith.constant 0 : index
    %c0_2 = arith.constant 0 : index
    %1 = vector.load %arg2[%c0_1, %c0_2] : memref<272x128xf32, #tpu.memory_space<vmem>>, vector<272x128xf32>
    %cst = arith.constant dense<0.000000e+00> : vector<32x128xf32>
    %2 = tpu.matmul %0, %1, %cst {dimension_numbers = #tpu.dot_dimension_numbers<[1], [0], [0], [1], [0, 0, 1, 1], [], []>} : vector<32x272xf32>, vector<272x128xf32>, vector<32x128xf32> -> vector<32x128xf32>
    %c0_3 = arith.constant 0 : index
    %c0_4 = arith.constant 0 : index
    %3 = vector.load %arg1[%c0_3, %c0_4] : memref<32x128xf32, #tpu.memory_space<vmem>>, vector<32x128xf32>
    %4 = arith.addf %2, %3 : vector<32x128xf32>
    %5 = math.tanh %4 : vector<32x128xf32>
    %c0_5 = arith.constant 0 : index
    %c0_6 = arith.constant 0 : index
    %6 = vector.load %arg4[%c0_5, %c0_6] : memref<1x32xf32, #tpu.memory_space<vmem>>, vector<1x32xf32>
    %cst_7 = arith.constant dense<0.000000e+00> : vector<1x128xf32>
    %7 = tpu.matmul %6, %5, %cst_7 {dimension_numbers = #tpu.dot_dimension_numbers<[1], [0], [0], [1], [0, 0, 1, 1], [], []>} : vector<1x32xf32>, vector<32x128xf32>, vector<1x128xf32> -> vector<1x128xf32>
    %8 = vector.extract_strided_slice %7 {offsets = [0, 0], sizes = [1, 64], strides = [1, 1]} : vector<1x128xf32> to vector<1x64xf32>
    %cst_8 = arith.constant dense<0xFF800000> : vector<1xf32>
    %9 = vector.multi_reduction <maximumf>, %8, %cst_8 [1] : vector<1x64xf32> to vector<1xf32>
    %10 = vector.shape_cast %9 : vector<1xf32> to vector<1x1xf32>
    %11 = vector.broadcast %10 : vector<1x1xf32> to vector<1x64xf32>
    %12 = arith.subf %8, %11 : vector<1x64xf32>
    %13 = math.exp %12 : vector<1x64xf32>
    %cst_9 = arith.constant dense<0.000000e+00> : vector<1xf32>
    %14 = vector.multi_reduction <add>, %13, %cst_9 [1] : vector<1x64xf32> to vector<1xf32>
    %15 = vector.shape_cast %14 : vector<1xf32> to vector<1x1xf32>
    %16 = tpu.reciprocal %15 : vector<1x1xf32> -> vector<1x1xf32>
    %17 = vector.broadcast %16 : vector<1x1xf32> to vector<1x64xf32>
    %18 = arith.mulf %13, %17 : vector<1x64xf32>
    %19 = vector.extract_strided_slice %7 {offsets = [0, 64], sizes = [1, 64], strides = [1, 1]} : vector<1x128xf32> to vector<1x64xf32>
    %cst_10 = arith.constant dense<0xFF800000> : vector<1xf32>
    %20 = vector.multi_reduction <maximumf>, %19, %cst_10 [1] : vector<1x64xf32> to vector<1xf32>
    %21 = vector.shape_cast %20 : vector<1xf32> to vector<1x1xf32>
    %22 = vector.broadcast %21 : vector<1x1xf32> to vector<1x64xf32>
    %23 = arith.subf %19, %22 : vector<1x64xf32>
    %24 = math.exp %23 : vector<1x64xf32>
    %cst_11 = arith.constant dense<0.000000e+00> : vector<1xf32>
    %25 = vector.multi_reduction <add>, %24, %cst_11 [1] : vector<1x64xf32> to vector<1xf32>
    %26 = vector.shape_cast %25 : vector<1xf32> to vector<1x1xf32>
    %27 = tpu.reciprocal %26 : vector<1x1xf32> -> vector<1x1xf32>
    %28 = vector.broadcast %27 : vector<1x1xf32> to vector<1x64xf32>
    %29 = arith.mulf %24, %28 : vector<1x64xf32>
    %30 = tpu.concatenate %18, %29 in 1 : vector<1x64xf32>, vector<1x64xf32> -> vector<1x128xf32>
    %c0_12 = arith.constant 0 : index
    %c0_13 = arith.constant 0 : index
    %31 = vector.load %arg5[%c0_12, %c0_13] : memref<1x128xf32, #tpu.memory_space<vmem>>, vector<1x128xf32>
    tpu.vector_store %arg5[%c0_12, %c0_13], %30 {strides = array<i32>} : memref<1x128xf32, #tpu.memory_space<vmem>>, vector<1x128xf32>,
    return
  }
  func.func @transform_0(%arg0: i32) -> (i32, i32) {
    %c0_i32 = arith.constant 0 : i32
    %c0_i32_0 = arith.constant 0 : i32
    return %c0_i32, %arg0 : i32, i32
  }
  func.func @transform_1(%arg0: i32) -> (i32, i32) {
    %c0_i32 = arith.constant 0 : i32
    %c0_i32_0 = arith.constant 0 : i32
    return %c0_i32, %arg0 : i32, i32
  }
  func.func @transform_2(%arg0: i32) -> (i32, i32) {
    %c0_i32 = arith.constant 0 : i32
    %c0_i32_0 = arith.constant 0 : i32
    %c0_i32_1 = arith.constant 0 : i32
    return %c0_i32, %c0_i32_0 : i32, i32
  }
  func.func @transform_3(%arg0: i32) -> (i32, i32) {
    %c0_i32 = arith.constant 0 : i32
    %c0_i32_0 = arith.constant 0 : i32
    %c0_i32_1 = arith.constant 0 : i32
    return %c0_i32, %c0_i32_0 : i32, i32
  }
  func.func @transform_4(%arg0: i32) -> (i32, i32) {
    %c0_i32 = arith.constant 0 : i32
    %c0_i32_0 = arith.constant 0 : i32
    return %c0_i32, %arg0 : i32, i32
  }
}

</mosaic_0001>

<bundles_post_ra>
// kernel: tpu_custom_call.1
= control target key start
LH: loop header
LB: loop body
LE: loop exit
PB: predicated region body
PF: predicated region fallthrough
CT: control target
= control target key end

     0   :  { %9 = vsyncpa [#allocation3], 0  ;;  %s670_s0 = inlined_call_operand.hbm [shape: f32[32,128], index: 0, kind: input, shape index: {}]   ;;  %s671_s1 = inlined_call_operand.hbm [shape: f32[272,128], index: 1, kind: input, shape index: {}]   ;;  %s672_s2 = inlined_call_operand.hbm [shape: f32[32,272], index: 2, kind: input, shape index: {}]   ;;  %s673_s3 = inlined_call_operand.vmem [shape: f32[1,32], index: 3, kind: input, shape index: {}]   ;;  %s674_s4 = inlined_call_operand.hbm [shape: f32[1,128], index: 4, kind: output, shape index: {}]  }
   0x1   :  { %10 = vsyncpa [#allocation6], 0 }
   0x2   :  { %11 = vsyncpa [#allocation4], 0  ;;  %s612_s15 = smov [#allocation5]   ;;  %s613_s17 = smov [#allocation2]  }
   0x3   :  { %s29_s16 = sshll.u32 %s612_s15, 4  ;;  %s17_s18 = sshll.u32 %s613_s17, 4  ;;  %s30_s16 = int_to_ptr.vmem [resolvable:$true] %s29_s16  ;;  %s18_s18 = int_to_ptr.vmem [resolvable:$true] %s17_s18 }
   0x4   :  { %s534_s19 = scalar_lea.vmem %s30_s16, 4352  ;;  %p539_p1 = scmp.lt.s32.totalorder %s30_s16, %s30_s16 }
   0x5   :  { %p535_p0 = scmp.ne.s32.totalorder %s30_s16, %s534_s19  ;;  %p540_p2 = scmp.lt.s32.totalorder %s534_s19, %s534_s19 }
   0x7   :  { %p541_p3 = por %p540_p2, %p539_p1 }
   0x9   :  { %p542_p4 = pnand %p541_p3, %p535_p0 }
   0xb   :  { %545 = shalt.err (!%p542_p4)
}
   0xc   :  { %s614_s20 = smov 128   ;;  %s615_s21 = smov 8  }
   0xd   :  { %35 = dma.hbm_to_vmem [thread:$0]  %s671_s1, 4352, %s30_s16, [#allocation6], %s614_s20, %s614_s20, %s615_s21  }
   0xe   :  { %s554_s24 = scalar_lea.vmem %s18_s18, 512  ;;  %p559_p6 = scmp.lt.s32.totalorder %s18_s18, %s18_s18 }
   0xf   :  { %p555_p5 = scmp.ne.s32.totalorder %s18_s18, %s554_s24  ;;  %p560_p7 = scmp.lt.s32.totalorder %s554_s24, %s554_s24 }
  0x11   :  { %p561_p8 = por %p560_p7, %p559_p6 }
  0x13   :  { %p562_p9 = pnand %p561_p8, %p555_p5 }
  0x15   :  { %565 = shalt.err (!%p562_p9)
}
  0x16   :  { %23 = dma.hbm_to_vmem [thread:$0]  %s670_s0, 512, %s18_s18, [#allocation3], %s614_s20, %s614_s20, %s615_s21  }
  0x17   :  { %s616_s27 = smov [#allocation7]  }
  0x18   :  { %s41_s28 = sshll.u32 %s616_s27, 4  ;;  %s42_s28 = int_to_ptr.vmem [resolvable:$true] %s41_s28 }
  0x19   :  { %s574_s29 = scalar_lea.vmem %s42_s28, 1536  ;;  %p579_p11 = scmp.lt.s32.totalorder %s42_s28, %s42_s28 }
  0x1a   :  { %p575_p10 = scmp.ne.s32.totalorder %s42_s28, %s574_s29  ;;  %p580_p12 = scmp.lt.s32.totalorder %s574_s29, %s574_s29 }
  0x1c   :  { %p581_p13 = por %p580_p12, %p579_p11 }
  0x1e   :  { %p582_p0 = pnand %p581_p13, %p575_p10 }
  0x20   :  { %585 = shalt.err (!%p582_p0)
}
  0x21   :  { %s617_s1 = smov 384   ;;  %s618_s30 = smov 24  }
  0x22   :  { %47 = dma.hbm_to_vmem [thread:$0]  %s672_s2, 1536, %s42_s28, [#allocation6], %s617_s1, %s617_s1, %s618_s30  }
  0x23   :  { %606 = dma.done.wait [#allocation3], 512  }
  0x24   :  { %607 = vsyncadd [#allocation3], 4294966784 }
  0x25   :  { %608 = dma.done.wait [#allocation6], 5888  }
  0x26   :  { %609 = vsyncadd [#allocation6], 4294961408  ;;  %v102_v0 = vld [vmem:[#allocation5 + $0xf8] sm:$0xff]  ;;  %v101_v2 = vld [vmem:[#allocation5 + $0xf0] sm:$0xff]  ;;  %vm109_vm0 = vcmask 130048   ;;  %v619_v46 = vmov 0.0  }
  0x27   :  { %v86_v1 = vld [vmem:[#allocation5 + $0x78] sm:$0xff]  ;;  %423 = vmatprep.subr.mxu0 %v102_v0  ;;  %v85_v3 = vld [vmem:[#allocation5 + $0x70] sm:$0xff]  ;;  %v100_v4 = vld [vmem:[#allocation5 + $0xe8] sm:$0xff]  ;;  %vm620_vm1 = vmmov 0   ;;  %vm297_vm2 = vcmask 261120   ;;  %vm383_vm3 = vcmask 1040896  }
  0x28   :  { %424 = vmatpush3.msra.mxu0 %v86_v1  ;;  %v84_v5 = vld [vmem:[#allocation5 + $0x68] sm:$0xff]  ;;  %v99_v6 = vld [vmem:[#allocation5 + $0xe0] sm:$0xff]  ;;  %v98_v8 = vld [vmem:[#allocation5 + $0xd8] sm:$0xff]  ;;  %vm371_vm4 = vcmask 516096   ;;  %s622_s7 = smov [#allocation8]   ;;  %vm399_vm5 = vcmask 523264  }
  0x29   :  { %425 = vmatprep.subr.mxu0 %v101_v2  ;;  %v83_v7 = vld [vmem:[#allocation5 + $0x60] sm:$0xff]  ;;  %v82_v9 = vld [vmem:[#allocation5 + $0x58] sm:$0xff]  ;;  %v97_v10 = vld [vmem:[#allocation5 + $0xd0] sm:$0xff]  ;;  %s408_s8 = sshll.u32 %s622_s7, 4  ;;  %s409_s8 = int_to_ptr.vmem [resolvable:$true] %s408_s8 }
  0x2a   :  { %426 = vmatpush3.msra.mxu0 %v85_v3  ;;  %v81_v11 = vld [vmem:[#allocation5 + $0x50] sm:$0xff]  ;;  %v96_v12 = vld [vmem:[#allocation5 + $0xc8] sm:$0xff]  ;;  %v60_v13 = vld [vmem:[#allocation7 + $0x8] sm:$0xff]  ;;  %s586_s9 = scalar_lea.vmem %s409_s8, 16  ;;  %s590_s10 = scalar_lea.vmem %s409_s8, 32 }
  0x2b   :  { %427 = vmatprep.subr.mxu0 %v100_v4  ;;  %v80_v14 = vld [vmem:[#allocation5 + $0x48] sm:$0xff]  ;;  %186 = vmatprep.mubr.f32.mxu0 %v60_v13  ;;  %v103_v16 = vld [vmem:[#allocation5 + $0x100] sm:$0xff]  ;;  %v94_v20 = vld [vmem:[#allocation5 + $0xb8] sm:$0xff]  ;;  %p587_p1 = scmp.ne.s32.totalorder %s409_s8, %s586_s9  ;;  %p591_p2 = scmp.lt.s32.totalorder %s409_s8, %s409_s8 }
  0x2c   :  { %428 = vmatpush3.msra.mxu0 %v84_v5  ;;  %v104_v15 = vld [vmem:[#allocation5 + $0x108] sm:$0xff]  ;;  %v95_v17 = vld [vmem:[#allocation5 + $0xc0] sm:$0xff]  ;;  %v64_v21 = vld [vmem:[#allocation7 + $0x28] sm:$0xff]  ;;  %p592_p3 = scmp.lt.s32.totalorder %s590_s10, %s586_s9 }
  0x2d   :  { %429 = vmatprep.subr.mxu0 %v99_v6  ;;  %478 = vmatprep.subr.mxu1 %v104_v15  ;;  %v79_v18 = vld [vmem:[#allocation5 + $0x40] sm:$0xff]  ;;  %v78_v22 = vld [vmem:[#allocation5 + $0x38] sm:$0xff]  ;;  %v67_v23 = vld [vmem:[#allocation7 + $0x40] sm:$0xff] }
  0x2e   :  { %430 = vmatpush3.msra.mxu0 %v83_v7  ;;  %479 = vmatpush3.msra.mxu1 %v104_v15  ;;  %v61_v19 = vld [vmem:[#allocation7 + $0x10] sm:$0xff]  ;;  %v93_v24 = vld [vmem:[#allocation5 + $0xb0] sm:$0xff]  ;;  %v92_v26 = vld [vmem:[#allocation5 + $0xa8] sm:$0xff]  ;;  %p593_p4 = por %p592_p3, %p591_p2 }
  0x2f   :  { %431 = vmatprep.subr.mxu0 %v98_v8  ;;  %480 = vmatprep.subr.mxu1 %v103_v16  ;;  %v77_v25 = vld [vmem:[#allocation5 + $0x30] sm:$0xff]  ;;  %v70_v27 = vld [vmem:[#allocation7 + $0x58] sm:$0xff]  ;;  %v91_v29 = vld [vmem:[#allocation5 + $0xa0] sm:$0xff] }
  0x30   :  { %432 = vmatpush3.msra.mxu0 %v82_v9  ;;  %481 = vmatpush3.msra.mxu1 %v103_v16  ;;  %v76_v28 = vld [vmem:[#allocation5 + $0x28] sm:$0xff]  ;;  %v75_v30 = vld [vmem:[#allocation5 + $0x20] sm:$0xff]  ;;  %v90_v31 = vld [vmem:[#allocation5 + $0x98] sm:$0xff]  ;;  %p594_p5 = pnand %p593_p4, %p587_p1 }
  0x31   :  { %433 = vmatprep.subr.mxu0 %v97_v10  ;;  %482 = vmatprep.mubr.msk.f32.mxu1 %vm109_vm0, %v61_v19  ;;  %v74_v32 = vld [vmem:[#allocation5 + $0x18] sm:$0xff]  ;;  %v89_v33 = vld [vmem:[#allocation5 + $0x90] sm:$0xff]  ;;  %v88_v35 = vld [vmem:[#allocation5 + $0x88] sm:$0xff] }
  0x32   :  { %434 = vmatpush3.msra.mxu0 %v81_v11  ;;  %483 = vmatmul.mubr.msk.f32.vlgmr.msra.gmra.mxu1 %vm109_vm0, %v64_v21  ;;  %v73_v34 = vld [vmem:[#allocation5 + $0x10] sm:$0xff]  ;;  %v72_v36 = vld [vmem:[#allocation5 + $0x8] sm:$0xff]  ;;  %v87_v37 = vld [vmem:[#allocation5 + $0x80] sm:$0xff] }
  0x33   :  { %435 = vmatprep.subr.mxu0 %v96_v12  ;;  %485 = vmatprep.mubr.msk.f32.mxu1 %vm109_vm0, %v67_v23  ;;  %v71_v38 = vld [vmem:[#allocation5] sm:$0xff]  ;;  %v59_v39 = vld [vmem:[#allocation7] sm:$0xff]  ;;  %v62_v41 = vld [vmem:[#allocation7 + $0x18] sm:$0xff] }
  0x34   :  { %436 = vmatpush3.msra.mxu0 %v80_v14  ;;  %v63_v40 = vld [vmem:[#allocation7 + $0x20] sm:$0xff]  ;;  %v66_v42 = vld [vmem:[#allocation7 + $0x38] sm:$0xff]  ;;  %v65_v43 = vld [vmem:[#allocation7 + $0x30] sm:$0xff]  ;;  %488 = vmatprep.subr.mxu1 %v619_v46 }
  0x35   :  { %437 = vmatprep.subr.mxu0 %v95_v17  ;;  %v69_v44 = vld [vmem:[#allocation7 + $0x50] sm:$0xff]  ;;  %v68_v45 = vld [vmem:[#allocation7 + $0x48] sm:$0xff]  ;;  %v107_v58 = vld [vmem:[#allocation2 + $0x10] sm:$0xff] }
  0x36   :  { %438 = vmatpush3.msra.mxu0 %v79_v18  ;;  %486 = vmatmul.mubr.msk.f32.gmra.mxu1 %vm109_vm0, %v70_v27  ;;  %v106_v60 = vld [vmem:[#allocation2 + $0x8] sm:$0xff]  ;;  %v108_v61 = vld [vmem:[#allocation2 + $0x18] sm:$0xff]  ;;  %v105_v2 = vld [vmem:[#allocation2] sm:$0xff] }
  0x37   :  { %439 = vmatprep.subr.mxu0 %v94_v20  ;;  %496 = vmatprep.mubr.msk.f32.mxu1 %vm620_vm1, %v619_v46  ;;  %v296_v14 = vld [vmem:[%s673_s3] sm:$0x1]  ;;  %s621_s3 = smov 64  }
  0x38   :  { %440 = vmatpush3.msra.mxu0 %v78_v22 }
  0x39   :  { %441 = vmatprep.subr.mxu0 %v93_v24 }
  0x3a   :  { %442 = vmatpush3.msra.mxu0 %v77_v25 }
  0x3b   :  { %443 = vmatprep.subr.mxu0 %v92_v26 }
  0x3c   :  { %444 = vmatpush3.msra.mxu0 %v76_v28 }
  0x3d   :  { %445 = vmatprep.subr.mxu0 %v91_v29 }
  0x3e   :  { %446 = vmatpush3.msra.mxu0 %v75_v30 }
  0x3f   :  { %447 = vmatprep.subr.mxu0 %v90_v31 }
  0x40   :  { %448 = vmatpush3.msra.mxu0 %v74_v32 }
  0x41   :  { %449 = vmatprep.subr.mxu0 %v89_v33 }
  0x42   :  { %450 = vmatpush3.msra.mxu0 %v73_v34 }
  0x43   :  { %451 = vmatprep.subr.mxu0 %v88_v35 }
  0x44   :  { %452 = vmatpush3.msra.mxu0 %v72_v36 }
  0x45   :  { %453 = vmatprep.subr.mxu0 %v87_v37 }
  0x46   :  { %454 = vmatpush3.msra.mxu0 %v71_v38 }
  0x47   :  { %187 = vmatmul.mubr.f32.vlgmr.msra.gmra.mxu0 %v59_v39 }
  0x48   :  { %191 = vmatprep.mubr.f32.mxu0 %v63_v40 }
  0x4b   :  { %192 = vmatmul.mubr.f32.gmra.mxu0 %v62_v41 }
  0x4c   :  { %196 = vmatprep.mubr.f32.mxu0 %v66_v42 }
  0x4f   :  { %197 = vmatmul.mubr.f32.gmra.mxu0 %v65_v43 }
  0x50   :  { %201 = vmatprep.mubr.f32.mxu0 %v69_v44 }
  0x53   :  { %202 = vmatmul.mubr.f32.gmra.mxu0 %v68_v45 }
  0xf2   :  { %v484_v50 = vpop.f32.mrf.mxu1 }
  0xf4   :  { %v273_v53 = vpop.f32.mrf.mxu1 }
  0xf6   :  { %v487_v57 = vpop.f32.mrf.mxu1 }
  0xf8   :  { %v283_v3 = vpop.f32.mrf.mxu1 }
 0x107   :  { %v455_v47 = vpop.f32.mrf.mxu0 }
 0x109   :  { %v456_v48 = vpop.f32.mrf.mxu0 }
 0x10a   :  { %v457_v63 = vadd.f32 %v456_v48, %v455_v47 }
 0x10b   :  { %v458_v49 = vpop.f32.mrf.mxu0 }
 0x10c   :  { %v189_v6 = vadd.f32 %v457_v63, %v105_v2 }
 0x10d   :  { %v459_v51 = vpop.f32.mrf.mxu0 }
 0x10e   :  { %v460_v59 = vadd.f32 %v459_v51, %v458_v49  ;;  %v274_v10 = vadd.f32 %v273_v53, %v189_v6 }
 0x10f   :  { %v461_v52 = vpop.f32.mrf.mxu0 }
 0x110   :  { %v194_v4 = vadd.f32 %v460_v59, %v106_v60 }
 0x111   :  { %v462_v54 = vpop.f32.mrf.mxu0 }
 0x112   :  { %v463_v55 = vadd.f32 %v462_v54, %v461_v52  ;;  %v279_v9 = vadd.f32 %v484_v50, %v194_v4 }
 0x113   :  { %v464_v56 = vpop.f32.mrf.mxu0 }
 0x114   :  { %v199_v1 = vadd.f32 %v463_v55, %v107_v58 }
 0x115   :  { %v465_v62 = vpop.f32.mrf.mxu0 }
 0x116   :  { %v466_v0 = vadd.f32 %v465_v62, %v464_v56  ;;  %v284_v8 = vadd.f32 %v283_v3, %v199_v1 }
 0x118   :  { %v204_v5 = vadd.f32 %v466_v0, %v108_v61 }
 0x11a   :  { %v289_v7 = vadd.f32 %v487_v57, %v204_v5 }
 0x11c   :  { %510 = vtanh.f32 %v289_v7 }
 0x11d   :  { %512 = vtanh.f32 %v284_v8 }
 0x11e   :  { %514 = vtanh.f32 %v279_v9 }
 0x11f   :  { %516 = vtanh.f32 %v274_v10 }
 0x129   :  { %v511_v11 = vpop.eup %510 }
 0x12a   :  { %489 = vmatpush3.msra.mxu1 %v511_v11  ;;  %v513_v12 = vpop.eup %512 }
 0x12b   :  { %490 = vmatprep.subr.mxu1 %v619_v46  ;;  %v515_v13 = vpop.eup %514 }
 0x12c   :  { %491 = vmatpush3.msra.mxu1 %v513_v12  ;;  %v517_v15 = vpop.eup %516 }
 0x12d   :  { %492 = vmatprep.subr.mxu1 %v619_v46 }
 0x12e   :  { %493 = vmatpush3.msra.mxu1 %v515_v13 }
 0x12f   :  { %494 = vmatprep.subr.mxu1 %v619_v46 }
 0x130   :  { %495 = vmatpush3.msra.mxu1 %v517_v15 }
 0x131   :  { %497 = vmatmul.mubr.msk.f32.vlgmr.msra.gmra.mxu1 %vm297_vm2, %v296_v14 }
 0x1f1   :  { %v367_v16 = vpop.f32.mrf.mxu1 }
 0x1f2   :  { %v384_v17 = vsel %vm383_vm3, %v367_v16, -inf  ;;  %v372_v19 = vsel %vm371_vm4, %v367_v16, -inf }
 0x1f3   :  { %385 = vmax.xlane.f32.xlu0 %v384_v17  ;;  %v498_v18 = vpop.f32.mrf.mxu1 }
 0x1f7   :  { %373 = vmax.xlane.f32.xlu0 %v372_v19 }
 0x27c   :  { %v386_v20 = vpop.xlane.xlu0 %385 }
 0x27d   :  { %v387_v21 = vsub.f32 %v367_v16, %v386_v20 }
 0x27f   :  { %v388_v22 = vmul.f32 1.442695, %v387_v21 }
 0x280   :  { %v374_v24 = vpop.xlane.xlu0 %373 }
 0x281   :  { %518 = vpow2.f32 %v388_v22  ;;  %v375_v25 = vsub.f32 %v367_v16, %v374_v24 }
 0x283   :  { %v376_v26 = vmul.f32 1.442695, %v375_v25 }
 0x285   :  { %520 = vpow2.f32 %v376_v26 }
 0x28e   :  { %v519_v23 = vpop.eup %518 }
 0x28f   :  { %391 = vrot.lane.b32.xlu1 %v519_v23, %s621_s3 }
 0x292   :  { %v521_v27 = vpop.eup %520 }
 0x293   :  { %v378_v28 = vsel %vm371_vm4, %v521_v27, 0.0 }
 0x2b3   :  { %379 = vadd.xlane.f32.xlu1 %v378_v28 }
 0x301   :  { %v392_v29 = vpop.permute.xlu1 %391 }
 0x302   :  { %v394_v30 = vsel %vm371_vm4, %v392_v29, 0.0 }
 0x303   :  { %395 = vadd.xlane.f32.xlu0 %v394_v30 }
 0x33c   :  { %v380_v31 = vpop.xlane.xlu1 %379 }
 0x33d   :  { %522 = vrcp.f32 %v380_v31 }
 0x34a   :  { %v523_v33 = vpop.eup %522 }
 0x34b   :  { %v382_v35 = vmul.f32 %v523_v33, %v521_v27 }
 0x38c   :  { %v396_v32 = vpop.xlane.xlu0 %395 }
 0x38d   :  { %524 = vrcp.f32 %v396_v32 }
 0x39a   :  { %v525_v34 = vpop.eup %524 }
 0x39b   :  { %v398_v36 = vmul.f32 %v525_v34, %v519_v23 }
 0x39d   :  { %v400_v37 = vsel %vm399_vm5, %v382_v35, %v398_v36 }
 0x39e   :  { %401 = vst [vmem:[#allocation8] sm:$0x1] %v400_v37 }
 0x39f   :  { %597 = shalt.err (!%p594_p5)
}
 0x3a0   :  { %411 = dma.vmem_to_hbm [thread:$0]  %s409_s8, 16, %s674_s4, [#allocation4]  }
 0x3a1   :  { %610 = dma.done.wait [#allocation4], 16  }
 0x3a2   :  { %611 = vsyncadd [#allocation4], 4294967280 }
 0x3a3   :  { %415 = vsyncpa [#allocation3], 1 }
 0x3a4   :  { %416 = vsyncpa [#allocation6], 1 }
 0x3a5   :  { %417 = vsyncpa [#allocation4], 1 }

</bundles_post_ra>
